<compile_context>
chip_gen: v5e
topology: v5e:2x2
jax: 0.10.0
libtpu: 0.0.40
codegen_flags: <defaults>
</compile_context>

<pallas_src>
import functools
import math

import jax
import jax.numpy as jnp
from jax.experimental import pallas as pl
from jax.experimental.pallas import tpu as pltpu


_VMEM_LIMIT = 32 * 1024 * 1024  # conservative: fits v7x's 64 MiB physical VMEM


def _choose_tile(dim, pref, align):
    """Largest tile <= pref that divides dim (aligned), else the full dim."""
    if dim <= pref:
        return dim
    t = (pref // align) * align
    while t > 0:
        if dim % t == 0:
            return t
        t -= align
    return dim


# ---------------------------------------------------------------------------
# Pallas kernels
# ---------------------------------------------------------------------------

def _layernorm_kernel(x_ref, alpha_ref, bias_ref, o_ref, *, eps, d):
    x = x_ref[...]                                        # (tm, D), f32
    mean = jnp.mean(x, axis=-1, keepdims=True)
    # torch.Tensor.std is unbiased (divides by n-1); eps is added to std.
    var = jnp.sum((x - mean) ** 2, axis=-1, keepdims=True) * (1.0 / (d - 1))
    std = jnp.sqrt(var)
    inv = pl.reciprocal(std + eps, approx=True)           # EUP slot, ~free
    o_ref[...] = alpha_ref[0] * (x - mean) * inv + bias_ref[0]


def _linear_kernel(x_ref, w_ref, b_ref, *rest, relu, has_residual):
    if has_residual:
        res_ref, o_ref, acc_ref = rest
    else:
        o_ref, acc_ref = rest

    k = pl.program_id(2)

    @pl.when(k == 0)
    def _():
        acc_ref[...] = jnp.zeros_like(acc_ref)

    # bf16 x bf16 -> f32 accumulation on the MXU.
    acc_ref[...] += jnp.dot(
        x_ref[...].astype(jnp.bfloat16), w_ref[...],
        preferred_element_type=jnp.float32)

    @pl.when(k == pl.num_programs(2) - 1)
    def _():
        y = acc_ref[...] + b_ref[...]
        if relu:
            y = jnp.maximum(y, 0.0)
        if has_residual:
            y = y + res_ref[...]                          # fused residual add
        o_ref[...] = y.astype(o_ref.dtype)


def _attn_kernel(qkv_ref, mask_ref, o_ref, *, num_heads, d_model, scale):
    qkv = qkv_ref[0]                                      # (S, 3D)
    m = mask_ref[0]                                       # (1, S), additive mask
    dk = d_model // num_heads

    q_all = qkv[:, 0:d_model]
    k_all = qkv[:, d_model:2 * d_model]
    v_all = qkv[:, 2 * d_model:3 * d_model]

    outs = []
    for h in range(num_heads):                            # static loop over heads
        sl = slice(h * dk, (h + 1) * dk)
        qh = q_all[:, sl].astype(jnp.bfloat16)
        kh = k_all[:, sl].astype(jnp.bfloat16)
        vh = v_all[:, sl].astype(jnp.bfloat16)
        s = jnp.dot(qh, kh.T, preferred_element_type=jnp.float32) * scale + m
        s = s - jnp.max(s, axis=-1, keepdims=True)
        p = jnp.exp(s)
        p = p * pl.reciprocal(jnp.sum(p, axis=-1, keepdims=True), approx=True)
        outs.append(jnp.dot(p.astype(jnp.bfloat16), vh,
                            preferred_element_type=jnp.float32))

    # Single lane-dense (S, D) store.
    o_ref[0] = jnp.concatenate(outs, axis=-1).astype(o_ref.dtype)


# ---------------------------------------------------------------------------
# Wrappers around pallas_call
# ---------------------------------------------------------------------------

def layer_norm(x, alpha, bias, eps=1e-6):
    B, S, D = x.shape
    M = B * S
    x2 = x.reshape(M, D)
    tm = _choose_tile(M, 512, 8)
    out = pl.pallas_call(
        functools.partial(_layernorm_kernel, eps=eps, d=D),
        out_shape=jax.ShapeDtypeStruct((M, D), x.dtype),
        grid=(M // tm,),
        in_specs=[
            pl.BlockSpec((tm, D), lambda i: (i, 0)),
            pl.BlockSpec(memory_space=pltpu.MemorySpace.SMEM),
            pl.BlockSpec(memory_space=pltpu.MemorySpace.SMEM),
        ],
        out_specs=pl.BlockSpec((tm, D), lambda i: (i, 0)),
        compiler_params=pltpu.CompilerParams(
            dimension_semantics=("parallel",),
            vmem_limit_bytes=_VMEM_LIMIT),
    )(x2, alpha, bias)
    return out.reshape(B, S, D)


def linear(x, w, b, residual=None, relu=False):
    """x: (..., K) @ w: (K, N) [bf16] + b: (N,), optional fused relu / residual."""
    lead = x.shape[:-1]
    K = x.shape[-1]
    N = w.shape[-1]
    M = math.prod(lead)
    x2 = x.reshape(M, K)

    tm = _choose_tile(M, 512, 8)
    tn = _choose_tile(N, 512, 128)
    tk = _choose_tile(K, 512, 128)
    grid = (M // tm, N // tn, K // tk)

    in_specs = [
        pl.BlockSpec((tm, tk), lambda i, j, k: (i, k)),
        pl.BlockSpec((tk, tn), lambda i, j, k: (k, j)),
        pl.BlockSpec((1, tn), lambda i, j, k: (0, j)),
    ]
    args = [x2, w, b.reshape(1, N)]
    if residual is not None:
        in_specs.append(pl.BlockSpec((tm, tn), lambda i, j, k: (i, j)))
        args.append(residual.reshape(M, N))

    out = pl.pallas_call(
        functools.partial(_linear_kernel, relu=relu,
                          has_residual=residual is not None),
        out_shape=jax.ShapeDtypeStruct((M, N), x.dtype),
        grid=grid,
        in_specs=in_specs,
        out_specs=pl.BlockSpec((tm, tn), lambda i, j, k: (i, j)),
        scratch_shapes=[pltpu.VMEM((tm, tn), jnp.float32)],
        compiler_params=pltpu.CompilerParams(
            dimension_semantics=("parallel", "parallel", "arbitrary"),
            vmem_limit_bytes=_VMEM_LIMIT),
    )(*args)
    return out.reshape(*lead, N)


def attention(qkv, mask_add, num_heads, d_model):
    """qkv: (B, S, 3*D); mask_add: (B, 1, S) additive (0 / -1e9)."""
    B, S, threeD = qkv.shape
    dk = d_model // num_heads
    scale = 1.0 / float(dk) ** 0.5
    return pl.pallas_call(
        functools.partial(_attn_kernel, num_heads=num_heads,
                          d_model=d_model, scale=scale),
        out_shape=jax.ShapeDtypeStruct((B, S, d_model), qkv.dtype),
        grid=(B,),
        in_specs=[
            pl.BlockSpec((1, S, threeD), lambda b: (b, 0, 0)),
            pl.BlockSpec((1, 1, S), lambda b: (b, 0, 0)),
        ],
        out_specs=pl.BlockSpec((1, S, d_model), lambda b: (b, 0, 0)),
        compiler_params=pltpu.CompilerParams(
            dimension_semantics=("parallel",),
            vmem_limit_bytes=_VMEM_LIMIT),
    )(qkv, mask_add)


# ---------------------------------------------------------------------------
# Encoder forward (dropout is identity in eval mode)
# ---------------------------------------------------------------------------

def encoder_forward(x, mask, params, num_heads):
    B, S, D = x.shape
    # Additive mask, constant across layers and heads: 0 = keep, -1e9 = masked.
    mask_add = jnp.where(mask == 0.0, -1e9, 0.0).astype(jnp.float32).reshape(B, 1, S)

    for lp in params["layers"]:
        # residual 1: x = x + SelfAttention(LN(x), mask)
        h = layer_norm(x, lp["rn1_alpha"], lp["rn1_bias"])
        qkv = linear(h, lp["wqkv"], lp["bqkv"])              # fused Q|K|V matmul
        attn = attention(qkv, mask_add, num_heads, D)
        x = linear(attn, lp["wo"], lp["bo"], residual=x)     # residual fused
        # residual 2: x = x + FFN(LN(x))
        h = layer_norm(x, lp["rn2_alpha"], lp["rn2_bias"])
        hh = linear(h, lp["w1"], lp["b1"], relu=True)
        x = linear(hh, lp["w2"], lp["b2"], residual=x)       # residual fused
    return layer_norm(x, params["norm_alpha"], params["norm_bias"])


# ---------------------------------------------------------------------------
# Deterministic parameter init (weights stored in bf16 for the MXU)
# ---------------------------------------------------------------------------

def init_params(key, n_layers, d_model, d_ff):
    params = {"layers": []}
    for i in range(n_layers):
        keys = jax.random.split(jax.random.fold_in(key, i), 6)
        wq = 0.1 * jax.random.normal(keys[0], (d_model, d_model), jnp.float32)
        wk = 0.1 * jax.random.normal(keys[1], (d_model, d_model), jnp.float32)
        wv = 0.1 * jax.random.normal(keys[2], (d_model, d_model), jnp.float32)
        lp = {
            "rn1_alpha": jnp.ones((1,), jnp.float32),
            "rn1_bias": jnp.zeros((1,), jnp.float32),
            "rn2_alpha": jnp.ones((1,), jnp.float32),
            "rn2_bias": jnp.zeros((1,), jnp.float32),
            # Fused QKV projection weight (D, 3D), bf16.
            "wqkv": jnp.concatenate([wq, wk, wv], axis=1).astype(jnp.bfloat16),
            "bqkv": jnp.zeros((3 * d_model,), jnp.float32),
            "wo": (0.1 * jax.random.normal(keys[3], (d_model, d_model),
                                           jnp.float32)).astype(jnp.bfloat16),
            "bo": jnp.zeros((d_model,), jnp.float32),
            "w1": (0.1 * jax.random.normal(keys[4], (d_model, d_ff),
                                           jnp.float32)).astype(jnp.bfloat16),
            "b1": jnp.zeros((d_ff,), jnp.float32),
            "w2": (0.1 * jax.random.normal(keys[5], (d_ff, d_model),
                                           jnp.float32)).astype(jnp.bfloat16),
            "b2": jnp.zeros((d_model,), jnp.float32),
        }
        params["layers"].append(lp)
    params["norm_alpha"] = jnp.ones((1,), jnp.float32)
    params["norm_bias"] = jnp.zeros((1,), jnp.float32)
    return params


# ---------------------------------------------------------------------------
# Main
# ---------------------------------------------------------------------------

if __name__ == "__main__":
    B, S, D = 2, 8, 32
    H, D_FF, N_LAYERS = 4, 64, 2

    key = jax.random.PRNGKey(0)
    k_x, k_p = jax.random.split(key)

    x = jax.random.normal(k_x, (B, S, D), jnp.float32)

    # Padding mask: batch 1 has its last two positions masked out.
    mask = jnp.ones((B, 1, 1, S), jnp.float32)
    mask = mask.at[1, :, :, 6:].set(0.0)

    params = init_params(k_p, N_LAYERS, D, D_FF)

    out = encoder_forward(x, mask, params, H)
    out = jax.block_until_ready(out)

    assert out.shape == (B, S, D)
    assert jnp.all(jnp.isfinite(out))
    print("KERNEL_OK")
</pallas_src>

<mosaic_0001>
module attributes {stable_mosaic.version = 11 : i64} {
  func.func @_layernorm_kernel(%arg0: i32, %arg1: memref<16x32xf32, #tpu.memory_space<vmem>>, %arg2: memref<1xf32, #tpu.memory_space<smem>>, %arg3: memref<1xf32, #tpu.memory_space<smem>>, %arg4: memref<16x32xf32, #tpu.memory_space<vmem>>) attributes {dimension_semantics = [#tpu.dimension_semantics<parallel>], iteration_bounds = array<i64: 1>, scalar_prefetch = 0 : i64, scratch_operands = 0 : i64, tpu.core_type = #tpu.core_type<tc>, window_params = [{transform_indices = @transform_0, window_bounds = array<i64: 16, 32>}, {transform_indices = @transform_1, window_bounds = array<i64: 1>}, {transform_indices = @transform_2, window_bounds = array<i64: 1>}, {transform_indices = @transform_3, window_bounds = array<i64: 16, 32>}]} {
    %c0 = arith.constant 0 : index
    %c0_0 = arith.constant 0 : index
    %0 = vector.load %arg1[%c0, %c0_0] : memref<16x32xf32, #tpu.memory_space<vmem>>, vector<16x32xf32>
    %cst = arith.constant dense<0.000000e+00> : vector<16xf32>
    %1 = vector.multi_reduction <add>, %0, %cst [1] : vector<16x32xf32> to vector<16xf32>
    %2 = vector.shape_cast %1 : vector<16xf32> to vector<16x1xf32>
    %cst_1 = arith.constant 3.200000e+01 : f32
    %3 = vector.broadcast %cst_1 : f32 to vector<16x1xf32>
    %4 = arith.divf %2, %3 : vector<16x1xf32>
    %5 = vector.broadcast %4 : vector<16x1xf32> to vector<16x32xf32>
    %6 = arith.subf %0, %5 : vector<16x32xf32>
    %7 = arith.mulf %6, %6 : vector<16x32xf32>
    %cst_2 = arith.constant dense<0.000000e+00> : vector<16xf32>
    %8 = vector.multi_reduction <add>, %7, %cst_2 [1] : vector<16x32xf32> to vector<16xf32>
    %9 = vector.shape_cast %8 : vector<16xf32> to vector<16x1xf32>
    %cst_3 = arith.constant 0.0322580636 : f32
    %10 = vector.broadcast %cst_3 : f32 to vector<16x1xf32>
    %11 = arith.mulf %9, %10 : vector<16x1xf32>
    %12 = math.sqrt %11 : vector<16x1xf32>
    %cst_4 = arith.constant 9.99999997E-7 : f32
    %13 = vector.broadcast %cst_4 : f32 to vector<16x1xf32>
    %14 = arith.addf %12, %13 : vector<16x1xf32>
    %15 = tpu.reciprocal %14 {approx = true} : vector<16x1xf32> -> vector<16x1xf32>
    %c0_5 = arith.constant 0 : index
    %16 = memref.load %arg2[%c0_5] : memref<1xf32, #tpu.memory_space<smem>>
    %17 = vector.broadcast %4 : vector<16x1xf32> to vector<16x32xf32>
    %18 = arith.subf %0, %17 : vector<16x32xf32>
    %19 = vector.broadcast %16 : f32 to vector<16x32xf32>
    %20 = arith.mulf %19, %18 : vector<16x32xf32>
    %21 = vector.broadcast %15 : vector<16x1xf32> to vector<16x32xf32>
    %22 = arith.mulf %20, %21 : vector<16x32xf32>
    %c0_6 = arith.constant 0 : index
    %23 = memref.load %arg3[%c0_6] : memref<1xf32, #tpu.memory_space<smem>>
    %24 = vector.broadcast %23 : f32 to vector<16x32xf32>
    %25 = arith.addf %22, %24 : vector<16x32xf32>
    %c0_7 = arith.constant 0 : index
    %c0_8 = arith.constant 0 : index
    %26 = vector.load %arg4[%c0_7, %c0_8] : memref<16x32xf32, #tpu.memory_space<vmem>>, vector<16x32xf32>
    tpu.vector_store %arg4[%c0_7, %c0_8], %25 {strides = array<i32>} : memref<16x32xf32, #tpu.memory_space<vmem>>, vector<16x32xf32>,
    return
  }
  func.func @transform_0(%arg0: i32) -> (i32, i32) {
    %c0_i32 = arith.constant 0 : i32
    %c0_i32_0 = arith.constant 0 : i32
    return %arg0, %c0_i32 : i32, i32
  }
  func.func @transform_1(%arg0: i32) -> i32 {
    %c0_i32 = arith.constant 0 : i32
    %c0_i32_0 = arith.constant 0 : i32
    return %c0_i32 : i32
  }
  func.func @transform_2(%arg0: i32) -> i32 {
    %c0_i32 = arith.constant 0 : i32
    %c0_i32_0 = arith.constant 0 : i32
    return %c0_i32 : i32
  }
  func.func @transform_3(%arg0: i32) -> (i32, i32) {
    %c0_i32 = arith.constant 0 : i32
    %c0_i32_0 = arith.constant 0 : i32
    return %arg0, %c0_i32 : i32, i32
  }
}

</mosaic_0001>

<bundles_post_ra>
// kernel: tpu_custom_call.1
= control target key start
LH: loop header
LB: loop body
LE: loop exit
PB: predicated region body
PF: predicated region fallthrough
CT: control target
= control target key end

     0   :  { %10 = vsyncpa [#allocation5], 0  ;;  %s238_s0 = inlined_call_operand.hbm [shape: f32[16,32], index: 0, kind: input, shape index: {}]   ;;  %s239_s1 = inlined_call_operand.<no memory space> [shape: f32[1], index: 1, kind: input, shape index: {}]   ;;  %s240_s2 = inlined_call_operand.<no memory space> [shape: f32[1], index: 2, kind: input, shape index: {}]   ;;  %s241_s3 = inlined_call_operand.hbm [shape: f32[16,32], index: 3, kind: output, shape index: {}]  }
   0x1   :  { %11 = vsyncpa [#allocation6], 0  ;;  %s16_s14 = sshll.u32 %s238_s0, 4  ;;  %s189_s15 = smov [#allocation4]   ;;  %s17_s14 = int_to_ptr.hbm [resolvable:$true] %s16_s14 }
   0x2   :  { %s18_s16 = sshll.u32 %s189_s15, 4  ;;  %s190_s17 = smov 128   ;;  %s19_s16 = int_to_ptr.vmem [resolvable:$true] %s18_s16 }
   0x3   :  { %s191_s18 = smov 8  }
   0x4   :  { %24 = dma.hbm_to_vmem [thread:$0]  %s17_s14, 256, %s19_s16, [#allocation5], %s190_s17, %s190_s17, %s191_s18  }
   0x5   :  { %185 = dma.done.wait [#allocation5], 256  }
   0x6   :  { %186 = vsyncadd [#allocation5], 4294967040  ;;  %vm35_vm0 = vcmask 261120   ;;  %v33_v0 = vld [vmem:[#allocation4] sm:$0xff]  ;;  %v34_v2 = vld [vmem:[#allocation4 + $0x8] sm:$0xff]  ;;  %v192_v4 = vmov 32.0   ;;  %v92_v42 = vstv %s239_s1  ;;  %v98_v50 = vstv %s240_s2 }
   0x7   :  { %v36_v1 = vsel %vm35_vm0, %v33_v0, 0.0  ;;  %v39_v3 = vsel %vm35_vm0, %v34_v2, 0.0  ;;  %127 = vrcp.f32 %v192_v4  ;;  %s193_s1 = smov [#allocation7]   ;;  %s109_s25 = sshll.u32 %s241_s3, 4  ;;  %s110_s25 = int_to_ptr.hbm [resolvable:$true] %s109_s25 }
   0x8   :  { %37 = vadd.xlane.f32.xlu0 %v36_v1  ;;  %s107_s22 = sshll.u32 %s193_s1, 4  ;;  %s108_s22 = int_to_ptr.vmem [resolvable:$true] %s107_s22 }
   0xd   :  { %v128_v5 = vpop.eup %127 }
   0xe   :  { %v43_v6 = vmul.f32 32.0, %v128_v5  ;;  %vm47_vm1 = vweird.f32 %v128_v5 }
  0x10   :  { %40 = vadd.xlane.f32.xlu0 %v39_v3  ;;  %v44_v7 = vsub.f32 1.0, %v43_v6 }
  0x12   :  { %v45_v8 = vmul.f32 %v128_v5, %v44_v7 }
  0x14   :  { %v46_v9 = vadd.f32 %v128_v5, %v45_v8 }
  0x16   :  { %v48_v10 = vsel %vm47_vm1, %v128_v5, %v46_v9 }
  0x7b   :  { %v38_v11 = vpop.xlane.xlu0 %37 }
  0x7c   :  { %v49_v12 = vmul.f32 %v48_v10, %v38_v11 }
  0x7e   :  { %v51_v13 = vsub.f32 %v33_v0, %v49_v12 }
  0x80   :  { %v53_v14 = vmul.f32 %v51_v13, %v51_v13  ;;  %v93_v46 = vmul.f32 %v92_v42, %v51_v13 }
  0x82   :  { %v55_v15 = vsel %vm35_vm0, %v53_v14, 0.0 }
  0x83   :  { %56 = vadd.xlane.f32.xlu1 %v55_v15  ;;  %v41_v16 = vpop.xlane.xlu0 %40 }
  0x84   :  { %v50_v17 = vmul.f32 %v48_v10, %v41_v16 }
  0x86   :  { %v52_v18 = vsub.f32 %v34_v2, %v50_v17 }
  0x88   :  { %v54_v19 = vmul.f32 %v52_v18, %v52_v18  ;;  %v94_v53 = vmul.f32 %v92_v42, %v52_v18 }
  0x8a   :  { %v58_v20 = vsel %vm35_vm0, %v54_v19, 0.0 }
  0x8b   :  { %59 = vadd.xlane.f32.xlu1 %v58_v20 }
  0xf6   :  { %v57_v21 = vpop.xlane.xlu1 %56 }
  0xf7   :  { %v61_v22 = vmul.f32 0.032258064, %v57_v21 }
  0xf9   :  { %129 = vrsqrt.f32 %v61_v22  ;;  %vm70_vm2 = vcmp.eq.f32.partialorder %v61_v22, inf  ;;  %v73_v35 = vand.u32 2147483648, %v61_v22  ;;  %vm72_vm3 = vcmp.eq.f32.partialorder %v61_v22, 0.0 }
  0xfe   :  { %v60_v23 = vpop.xlane.xlu1 %59 }
  0xff   :  { %v130_v24 = vpop.eup %129  ;;  %v62_v25 = vmul.f32 0.032258064, %v60_v23 }
 0x100   :  { %v64_v26 = vmul.f32 %v130_v24, %v61_v22 }
 0x101   :  { %131 = vrsqrt.f32 %v62_v25  ;;  %vm82_vm4 = vcmp.eq.f32.partialorder %v62_v25, inf  ;;  %v85_v44 = vand.u32 2147483648, %v62_v25  ;;  %vm84_vm5 = vcmp.eq.f32.partialorder %v62_v25, 0.0 }
 0x102   :  { %v65_v27 = vmul.f32 %v130_v24, %v64_v26 }
 0x104   :  { %v66_v28 = vmul.f32 0.5, %v65_v27 }
 0x106   :  { %v67_v29 = vsub.f32 1.5, %v66_v28 }
 0x107   :  { %v132_v30 = vpop.eup %131 }
 0x108   :  { %v68_v31 = vmul.f32 %v130_v24, %v67_v29  ;;  %v76_v32 = vmul.f32 %v132_v30, %v62_v25 }
 0x10a   :  { %v69_v33 = vmul.f32 %v68_v31, %v61_v22  ;;  %v77_v34 = vmul.f32 %v132_v30, %v76_v32 }
 0x10c   :  { %v78_v36 = vmul.f32 0.5, %v77_v34  ;;  %v71_v37 = vsel %vm70_vm2, %v61_v22, %v69_v33 }
 0x10d   :  { %v74_v38 = vsel %vm72_vm3, %v73_v35, %v71_v37 }
 0x10e   :  { %v79_v39 = vsub.f32 1.5, %v78_v36  ;;  %v87_v40 = vadd.f32 1e-06, %v74_v38 }
 0x110   :  { %v80_v41 = vmul.f32 %v132_v30, %v79_v39  ;;  %133 = vrcp.f32 %v87_v40 }
 0x112   :  { %v81_v43 = vmul.f32 %v80_v41, %v62_v25 }
 0x114   :  { %v83_v45 = vsel %vm82_vm4, %v62_v25, %v81_v43 }
 0x115   :  { %v86_v47 = vsel %vm84_vm5, %v85_v44, %v83_v45 }
 0x116   :  { %v134_v48 = vpop.eup %133  ;;  %v88_v49 = vadd.f32 1e-06, %v86_v47 }
 0x117   :  { %v95_v51 = vmul.f32 %v134_v48, %v93_v46 }
 0x118   :  { %135 = vrcp.f32 %v88_v49 }
 0x119   :  { %v99_v52 = vadd.f32 %v98_v50, %v95_v51 }
 0x11b   :  { %101 = vst.msk [vmem:[#allocation7] sm:$0xff] %vm35_vm0, %v99_v52 }
 0x11e   :  { %v136_v54 = vpop.eup %135 }
 0x11f   :  { %v96_v55 = vmul.f32 %v136_v54, %v94_v53 }
 0x121   :  { %v100_v56 = vadd.f32 %v98_v50, %v96_v55 }
 0x123   :  { %102 = vst.msk [vmem:[#allocation7 + $0x8] sm:$0xff] %vm35_vm0, %v100_v56 }
 0x124   :  { %115 = dma.vmem_to_hbm [thread:$0]  %s108_s22, 256, %s110_s25, [#allocation6], %s190_s17, %s190_s17, %s191_s18  }
 0x125   :  { %187 = dma.done.wait [#allocation6], 256  }
 0x126   :  { %188 = vsyncadd [#allocation6], 4294967040 }
 0x127   :  { %120 = vsyncpa [#allocation5], 1 }
 0x128   :  { %121 = vsyncpa [#allocation6], 1 }

</bundles_post_ra>
